<compile_context>
chip_gen: v7x
topology: tpu7x:2x2x1
jax: 0.10.0
libtpu: 0.0.40
codegen_flags: <defaults>
</compile_context>

<pallas_src>
import functools

import jax
import jax.numpy as jnp
from jax.experimental import pallas as pl
from jax.experimental.pallas import tpu as pltpu


def _round_up(x, m):
    return ((x + m - 1) // m) * m


def _elb_kernel(params_ref, scores_ref, labels_ref, out_ref, *,
                n_rows, n_cols, block_n):
    """Per row-block: neighbor diff + left/right flip + ELB penalty + partial sum."""
    # Hoisted scalars (computed on host): t, 1/t, -1/t^2, -1/t*log(1/t^2)+1/t
    t = params_ref[0, 0]
    inv_t = params_ref[0, 1]
    ct = params_ref[0, 2]
    cgreat = params_ref[0, 3]

    s = scores_ref[...].astype(jnp.float32)          # (block_n, c_pad)
    y = labels_ref[...]                               # (block_n, 1) int32

    bn, cp = s.shape

    # _NeighborDifferentiator: seeleft[:, j] = s[:, j] - s[:, j+1].
    # XLU rotate keeps the lane layout dense (no unaligned (C-1)-wide slices);
    # the wrap-around column is masked out below.
    s_next = pltpu.roll(s, cp - 1, 1)                 # s_next[:, j] == s[:, (j+1) % cp]
    seeleft = s - s_next

    col = jax.lax.broadcasted_iota(jnp.int32, (bn, cp), 1)
    row = jax.lax.broadcasted_iota(jnp.int32, (bn, cp), 0) + pl.program_id(0) * block_n

    # _RightAndLeftDelta: +seeleft left of the label, -seeleft at/right of it.
    diff = jnp.where(col < y, seeleft, -seeleft)

    # _ExtendedLB penalty. Single per-element transcendental (log); clamp its
    # argument so the unselected branch stays finite.
    neg_diff = jnp.maximum(-diff, jnp.float32(1e-30))
    loss_less = -inv_t * jnp.log(neg_diff)
    loss_great = t * diff + cgreat
    loss = jnp.where(diff <= ct, loss_less, loss_great)

    # Mask wrap-around column, class padding and row padding.
    valid = (col < (n_cols - 1)) & (row < n_rows)
    loss = jnp.where(valid, loss, jnp.float32(0.0))

    # Fold the block onto 8 sublanes with plain VPU adds; final (tiny) reduce
    # + divide-by-N happens in the wrapper.
    out_ref[0] = loss.reshape(bn // 8, 8, cp).sum(axis=0)


def extended_lb_loss(scores, labels, t_lb=1.0):
    """Pallas wrapper reproducing _ExtendedLB(init_t=t_lb).forward(scores, labels)."""
    assert scores.ndim == 2 and scores.shape[1] > 1
    n, c = scores.shape
    itemsize = jnp.dtype(scores.dtype).itemsize

    # Lane-dense class dim; row-block sized to keep double-buffered tiles and
    # intermediates comfortably inside scoped VMEM on all generations
    # (~2 MiB scores tile per pipeline buffer, v7x has only 64 MiB VMEM).
    c_pad = max(128, _round_up(c, 128))
    target_tile_bytes = 2 * 1024 * 1024
    block_n = max(8, (min(4096, target_tile_bytes // (c_pad * itemsize)) // 8) * 8)
    block_n = min(block_n, _round_up(n, 8))
    n_pad = _round_up(n, block_n)
    num_blocks = n_pad // block_n

    scores_p = scores                                  # keep native dtype (no wrapper upcast)
    if (n_pad, c_pad) != (n, c):
        scores_p = jnp.pad(scores, ((0, n_pad - n), (0, c_pad - c)))
    labels_p = labels.astype(jnp.int32).reshape(n, 1)
    if n_pad != n:
        labels_p = jnp.pad(labels_p, ((0, n_pad - n), (0, 0)))

    # Host-side scalar math on t (kept out of the per-element vector path).
    t = jnp.asarray(t_lb, dtype=jnp.float32)
    inv_t = 1.0 / t
    params = jnp.stack(
        [t, inv_t, -(inv_t * inv_t), -inv_t * jnp.log(inv_t * inv_t) + inv_t]
    ).reshape(1, 4).astype(jnp.float32)

    kernel = functools.partial(_elb_kernel, n_rows=n, n_cols=c, block_n=block_n)

    partials = pl.pallas_call(
        kernel,
        out_shape=jax.ShapeDtypeStruct((num_blocks, 8, c_pad), jnp.float32),
        grid=(num_blocks,),
        in_specs=[
            pl.BlockSpec(memory_space=pltpu.MemorySpace.SMEM),      # t-derived scalars
            pl.BlockSpec((block_n, c_pad), lambda i: (i, 0)),       # scores row block
            pl.BlockSpec((block_n, 1), lambda i: (i, 0)),           # labels row block
        ],
        out_specs=pl.BlockSpec((1, 8, c_pad), lambda i: (i, 0, 0)),  # per-block partial sums
        compiler_params=pltpu.CompilerParams(
            dimension_semantics=("parallel",),
            vmem_limit_bytes=48 * 1024 * 1024,
        ),
    )(params, scores_p, labels_p)

    # loss_mtx.sum(dim=1).mean() == total_sum / N (true N, not padded).
    return jnp.sum(partials) / jnp.float32(n)


def _reference_loss(scores, labels, t_lb=1.0):
    """Pure-JAX reference matching the PyTorch module semantics."""
    s = scores.astype(jnp.float32)
    y = labels.astype(jnp.float32).reshape(-1, 1)
    seeleft = s[:, :-1] - s[:, 1:]
    n, w = seeleft.shape
    idx = jnp.arange(w, dtype=jnp.float32)[None, :].repeat(n, axis=0)
    left_on = (idx < y).astype(jnp.float32)
    diff = left_on * seeleft + (1.0 - left_on) * (-seeleft)
    t = jnp.float32(t_lb)
    ct = -(1.0 / t ** 2)
    loss_less = -(1.0 / t) * jnp.log(-diff)
    loss_great = t * diff - (1.0 / t) * jnp.log(1.0 / t ** 2) + 1.0 / t
    loss_mtx = jnp.where(diff <= ct, loss_less, loss_great)
    return loss_mtx.sum(axis=1).mean()


if __name__ == "__main__":
    key = jax.random.PRNGKey(0)
    k1, k2, k3, k4 = jax.random.split(key, 4)

    # Case 1: small synthetic shapes, default t.
    N, C = 8, 16
    scores = jax.random.normal(k1, (N, C), dtype=jnp.float32)
    labels = jax.random.randint(k2, (N,), 0, C, dtype=jnp.int32)
    loss = jax.block_until_ready(extended_lb_loss(scores, labels, t_lb=1.0))
    ref = _reference_loss(scores, labels, t_lb=1.0)
    assert jnp.allclose(loss, ref, rtol=1e-5, atol=1e-5), (loss, ref)

    # Case 2: shapes exercising row/column padding + non-default t.
    N2, C2 = 10, 21
    scores2 = jax.random.normal(k3, (N2, C2), dtype=jnp.float32)
    labels2 = jax.random.randint(k4, (N2,), 0, C2, dtype=jnp.int32)
    loss2 = jax.block_until_ready(extended_lb_loss(scores2, labels2, t_lb=1.5))
    ref2 = _reference_loss(scores2, labels2, t_lb=1.5)
    assert jnp.allclose(loss2, ref2, rtol=1e-5, atol=1e-5), (loss2, ref2)

    print("KERNEL_OK")
</pallas_src>

<mosaic_0001>
module attributes {stable_mosaic.version = 11 : i64} {
  func.func @_elb_kernel(%arg0: i32, %arg1: memref<1x4xf32, #tpu.memory_space<smem>>, %arg2: memref<8x128xf32, #tpu.memory_space<vmem>>, %arg3: memref<8x1xi32, #tpu.memory_space<vmem>>, %arg4: memref<1x8x128xf32, #tpu.memory_space<vmem>>) attributes {dimension_semantics = [#tpu.dimension_semantics<parallel>], iteration_bounds = array<i64: 1>, scalar_prefetch = 0 : i64, scratch_operands = 0 : i64, tpu.core_type = #tpu.core_type<tc>, window_params = [{transform_indices = @transform_0, window_bounds = array<i64: 1, 4>}, {transform_indices = @transform_1, window_bounds = array<i64: 8, 128>}, {transform_indices = @transform_2, window_bounds = array<i64: 8, 1>}, {transform_indices = @transform_3, window_bounds = array<i64: 1, 8, 128>}]} {
    %c0 = arith.constant 0 : index
    %c0_0 = arith.constant 0 : index
    %0 = memref.load %arg1[%c0, %c0_0] : memref<1x4xf32, #tpu.memory_space<smem>>
    %c0_1 = arith.constant 0 : index
    %c1 = arith.constant 1 : index
    %1 = memref.load %arg1[%c0_1, %c1] : memref<1x4xf32, #tpu.memory_space<smem>>
    %c0_2 = arith.constant 0 : index
    %c2 = arith.constant 2 : index
    %2 = memref.load %arg1[%c0_2, %c2] : memref<1x4xf32, #tpu.memory_space<smem>>
    %c0_3 = arith.constant 0 : index
    %c3 = arith.constant 3 : index
    %3 = memref.load %arg1[%c0_3, %c3] : memref<1x4xf32, #tpu.memory_space<smem>>
    %c0_4 = arith.constant 0 : index
    %c0_5 = arith.constant 0 : index
    %4 = vector.load %arg2[%c0_4, %c0_5] : memref<8x128xf32, #tpu.memory_space<vmem>>, vector<8x128xf32>
    %c0_6 = arith.constant 0 : index
    %c0_7 = arith.constant 0 : index
    %5 = vector.load %arg3[%c0_6, %c0_7] : memref<8x1xi32, #tpu.memory_space<vmem>>, vector<8x1xi32>
    %c127_i32 = arith.constant 127 : i32
    %6 = tpu.dynamic_rotate %4 by %c127_i32 dim 1 : vector<8x128xf32>, i32 -> vector<8x128xf32>
    %7 = arith.subf %4, %6 : vector<8x128xf32>
    %8 = tpu.iota {dimensions = array<i32: 1>} : vector<8x128xi32>
    %9 = tpu.iota {dimensions = array<i32: 0>} : vector<8x128xi32>
    %c8_i32 = arith.constant 8 : i32
    %10 = arith.muli %arg0, %c8_i32 : i32
    %11 = vector.broadcast %10 : i32 to vector<8x128xi32>
    %12 = arith.addi %9, %11 : vector<8x128xi32>
    %13 = vector.broadcast %5 : vector<8x1xi32> to vector<8x128xi32>
    %14 = arith.cmpi slt, %8, %13 : vector<8x128xi32>
    %cst = arith.constant 0.000000e+00 : f32
    %15 = vector.broadcast %cst : f32 to vector<8x128xf32>
    %16 = arith.subf %15, %7 : vector<8x128xf32>
    %17 = arith.select %14, %7, %16 : vector<8x128xi1>, vector<8x128xf32>
    %cst_8 = arith.constant 0.000000e+00 : f32
    %18 = vector.broadcast %cst_8 : f32 to vector<8x128xf32>
    %19 = arith.subf %18, %17 : vector<8x128xf32>
    %cst_9 = arith.constant 1.000000e-30 : f32
    %20 = vector.broadcast %cst_9 : f32 to vector<8x128xf32>
    %21 = arith.maximumf %19, %20 : vector<8x128xf32>
    %cst_10 = arith.constant 0.000000e+00 : f32
    %22 = arith.subf %cst_10, %1 : f32
    %23 = math.log %21 : vector<8x128xf32>
    %24 = vector.broadcast %22 : f32 to vector<8x128xf32>
    %25 = arith.mulf %24, %23 : vector<8x128xf32>
    %26 = vector.broadcast %0 : f32 to vector<8x128xf32>
    %27 = arith.mulf %26, %17 : vector<8x128xf32>
    %28 = vector.broadcast %3 : f32 to vector<8x128xf32>
    %29 = arith.addf %27, %28 : vector<8x128xf32>
    %30 = vector.broadcast %2 : f32 to vector<8x128xf32>
    %31 = arith.cmpf ole, %17, %30 : vector<8x128xf32>
    %32 = arith.select %31, %25, %29 : vector<8x128xi1>, vector<8x128xf32>
    %c15_i32 = arith.constant 15 : i32
    %33 = vector.broadcast %c15_i32 : i32 to vector<8x128xi32>
    %34 = arith.cmpi slt, %8, %33 : vector<8x128xi32>
    %c8_i32_11 = arith.constant 8 : i32
    %35 = vector.broadcast %c8_i32_11 : i32 to vector<8x128xi32>
    %36 = arith.cmpi slt, %12, %35 : vector<8x128xi32>
    %37 = arith.andi %34, %36 : vector<8x128xi1>
    %cst_12 = arith.constant 0.000000e+00 : f32
    %38 = vector.broadcast %cst_12 : f32 to vector<8x128xf32>
    %39 = arith.select %37, %32, %38 : vector<8x128xi1>, vector<8x128xf32>
    %40 = vector.shape_cast %39 : vector<8x128xf32> to vector<1x8x128xf32>
    %cst_13 = arith.constant dense<0.000000e+00> : vector<8x128xf32>
    %41 = vector.multi_reduction <add>, %40, %cst_13 [0] : vector<1x8x128xf32> to vector<8x128xf32>
    %c0_14 = arith.constant 0 : index
    %c0_15 = arith.constant 0 : index
    %c0_16 = arith.constant 0 : index
    %42 = vector.load %arg4[%c0_14, %c0_15, %c0_16] : memref<1x8x128xf32, #tpu.memory_space<vmem>>, vector<1x8x128xf32>
    %43 = vector.shape_cast %42 : vector<1x8x128xf32> to vector<8x128xf32>
    %44 = vector.shape_cast %41 : vector<8x128xf32> to vector<1x8x128xf32>
    tpu.vector_store %arg4[%c0_14, %c0_15, %c0_16], %44 {strides = array<i32>} : memref<1x8x128xf32, #tpu.memory_space<vmem>>, vector<1x8x128xf32>,
    return
  }
  func.func @transform_0(%arg0: i32) -> (i32, i32) {
    %c0_i32 = arith.constant 0 : i32
    %c0_i32_0 = arith.constant 0 : i32
    %c0_i32_1 = arith.constant 0 : i32
    return %c0_i32, %c0_i32_0 : i32, i32
  }
  func.func @transform_1(%arg0: i32) -> (i32, i32) {
    %c0_i32 = arith.constant 0 : i32
    %c0_i32_0 = arith.constant 0 : i32
    return %arg0, %c0_i32 : i32, i32
  }
  func.func @transform_2(%arg0: i32) -> (i32, i32) {
    %c0_i32 = arith.constant 0 : i32
    %c0_i32_0 = arith.constant 0 : i32
    return %arg0, %c0_i32 : i32, i32
  }
  func.func @transform_3(%arg0: i32) -> (i32, i32, i32) {
    %c0_i32 = arith.constant 0 : i32
    %c0_i32_0 = arith.constant 0 : i32
    %c0_i32_1 = arith.constant 0 : i32
    return %arg0, %c0_i32, %c0_i32_0 : i32, i32, i32
  }
}

</mosaic_0001>

<bundles_post_ra>
// kernel: tpu_custom_call.1
= control target key start
LH: loop header
LB: loop body
LE: loop exit
PB: predicated region body
PF: predicated region fallthrough
CT: control target
= control target key end

     0   :  { %8 = vsyncpa [#allocation4], 0  ;;  %s178_s0 = inlined_call_operand.vmem [shape: f32[1,4], index: 0, kind: input, shape index: {}]   ;;  %s179_s1 = inlined_call_operand.vmem [shape: f32[8,128], index: 1, kind: input, shape index: {}]   ;;  %s180_s2 = inlined_call_operand.vmem [shape: s32[8,1], index: 2, kind: input, shape index: {}]   ;;  %s181_s3 = inlined_call_operand.hbm [shape: f32[1,8,128], index: 3, kind: output, shape index: {}]  }
   0x1   :  { %9 = vsyncpa [#allocation3], 0  ;;  %s16_s14 = sshll.u32 %s178_s0, 4  ;;  %s17_s14 = int_to_ptr.vmem [resolvable:$true] %s16_s14 }
   0x2   :  { %s95_s15 = scalar_lea.vmem %s17_s14, 16  ;;  %p100_p1 = scmp.lt.s32.totalorder %s17_s14, %s17_s14 }
   0x3   :  { %p96_p0 = scmp.ne.s32.totalorder %s17_s14, %s95_s15  ;;  %p101_p2 = scmp.lt.s32.totalorder %s95_s15, %s95_s15 }
   0x5   :  { %p102_p3 = por %p101_p2, %p100_p1 }
   0x7   :  { %p103_p4 = pnand %p102_p3, %p96_p0 }
   0x9   :  { %106 = shalt.err (!%p103_p4)
}
   0xa   :  { %s133_s16 = smov [#allocation2]  }
   0xb   :  { %19 = dma.vmem_to_smem %s17_s14, 16, %s133_s16, [#allocation4]  }
   0xc   :  { %129 = dma.done.wait [#allocation4], 16  }
   0xd   :  { %130 = vsyncadd [#allocation4], 4294967280 }
   0xe   :  { %27 = sfence }
   0xf   :  { %v33_v0 = vld [vmem:[%s180_s2] sm:$0xff]  ;;  %v134_v1 = vmov 0   ;;  %s135_s20 = smov 127   ;;  %v37_v3 = vlaneseq  ;;  %s28_s21 = sld [smem:[#allocation2]] }
  0x10   :  { %92 = vset.pattern.permute.xlu0 %v134_v1  ;;  %v32_v2 = vld [vmem:[%s179_s1] sm:$0xff]  ;;  %s85_s2 = sld [smem:[#allocation2 + $0x1]]  ;;  %s87_s22 = sld [smem:[#allocation2 + $0x3]] }
  0x11   :  { %45 = vperm.xlu0 %92, %v33_v0   ;;  %v38_v5 = vand.u32 127, %v37_v3  ;;  %s86_s23 = sld [smem:[#allocation2 + $0x2]]  ;;  %s136_s1 = smov [#allocation5]  }
  0x12   :  { %s76_s25 = sshll.u32 %s136_s1, 4  ;;  %s77_s25 = int_to_ptr.vmem [resolvable:$true] %s76_s25 }
  0x13   :  { %vm64_vm1 = vcmp.lt.s32.totalorder %v38_v5, 15  ;;  %s107_s26 = scalar_lea.vmem %s77_s25, 128  ;;  %p112_p6 = scmp.lt.s32.totalorder %s77_s25, %s77_s25 }
  0x14   :  { %p108_p5 = scmp.ne.s32.totalorder %s77_s25, %s107_s26  ;;  %p113_p7 = scmp.lt.s32.totalorder %s107_s26, %s107_s26 }
  0x15   :  { %34 = vrot.lane.b32.xlu0 %v32_v2, %s135_s20  ;;  %v57_v12 = vstv %s28_s21 }
  0x16   :  { %s52_s24 = ssub.f32 0.0, %s85_s2  ;;  %v59_v16 = vstv %s87_s22  ;;  %p114_p8 = por %p113_p7, %p112_p6 }
  0x17   :  { %v61_v18 = vstv %s86_s23 }
  0x18   :  { %v55_v15 = vstv %s52_s24  ;;  %p115_p9 = pnand %p114_p8, %p108_p5 }
  0x90   :  { %v46_v4 = vpop.permute.xlu0 %45 }
  0x91   :  { %vm47_vm0 = vcmp.lt.s32.totalorder %v38_v5, %v46_v4 }
  0x94   :  { %v35_v6 = vpop.permute.xlu0 %34 }
  0x95   :  { %v36_v7 = vsub.f32 %v32_v2, %v35_v6 }
  0x97   :  { %v48_v8 = vsub.f32 0.0, %v36_v7 }
  0x99   :  { %v49_v9 = vsel %vm47_vm0, %v36_v7, %v48_v8 }
  0x9a   :  { %v50_v10 = vsub.f32 0.0, %v49_v9  ;;  %v58_v13 = vmul.f32 %v57_v12, %v49_v9  ;;  %vm62_vm2 = vcmp.le.f32.partialorder %v49_v9, %v61_v18 }
  0x9c   :  { %v51_v11 = vmax.f32 %v50_v10, 1e-30  ;;  %v60_v20 = vadd.f32 %v59_v16, %v58_v13 }
  0x9e   :  { %93 = vlog2.f32 %v51_v11 }
  0xa8   :  { %v94_v14 = vpop.eup %93 }
  0xa9   :  { %v54_v17 = vmul.f32 0.6931472, %v94_v14 }
  0xab   :  { %v56_v19 = vmul.f32 %v55_v15, %v54_v17 }
  0xad   :  { %v63_v21 = vsel %vm62_vm2, %v56_v19, %v60_v20 }
  0xae   :  { %v67_v22 = vsel %vm64_vm1, %v63_v21, 0.0 }
  0xaf   :  { %69 = vst [vmem:[#allocation5] sm:$0xff] %v67_v22 }
  0xb0   :  { %118 = shalt.err (!%p115_p9)
}
  0xb1   :  { %s119_s29 = scalar_lea.hbm %s181_s3, 128 }
  0xb2   :  { %p120_p10 = scmp.ne.s32.totalorder %s181_s3, %s119_s29  ;;  %p123_p11 = scmp.lt.u32.totalorder %s119_s29, %s181_s3 }
  0xb4   :  { %p125_p12 = pnand %p123_p11, %p120_p10 }
  0xb6   :  { %128 = shalt.err (!%p125_p12)
}
  0xb7   :  { %79 = dma.vmem_to_hbm [thread:$0]  %s77_s25, 128, %s181_s3, [#allocation3]  }
  0xb8   :  { %131 = dma.done.wait [#allocation3], 128  }
  0xb9   :  { %132 = vsyncadd [#allocation3], 4294967168 }
  0xba   :  { %83 = vsyncpa [#allocation3], 1 }
  0xbb   :  { %84 = vsyncpa [#allocation4], 1 }

</bundles_post_ra>
